<compile_context>
chip_gen: v7x
topology: tpu7x:2x2x1
jax: 0.10.0
libtpu: 0.0.40
codegen_flags: <defaults>
</compile_context>

<pallas_src>
import functools
import math

import jax
import jax.numpy as jnp
from jax import lax
from jax.experimental import pallas as pl
from jax.experimental.pallas import tpu as pltpu


# ----------------------------------------------------------------------------
# small helpers
# ----------------------------------------------------------------------------
def _pick_tile(n, candidates):
    """First candidate tile that divides n; else the full extent."""
    for c in candidates:
        if c <= n and n % c == 0:
            return c
    return n


def _padded_block_bytes(shape, dtype=jnp.float32):
    """f32 VMEM footprint of a block padded to the native (8, 128) tiling."""
    shape = tuple(int(s) for s in shape)
    if len(shape) == 1:
        shape = (1,) + shape
    lead, (s2, s1) = shape[:-2], shape[-2:]
    n = (-(-s2 // 8) * 8) * (-(-s1 // 128) * 128)
    for l in lead:
        n *= l
    return n * jnp.dtype(dtype).itemsize


_VMEM_CAP_CACHE = [None]


def _device_vmem_cap():
    """Physical VMEM capacity (64 MiB on v7x, 128 MiB on v5e/v6e); safe fallback."""
    if _VMEM_CAP_CACHE[0] is None:
        cap = 128 << 20
        try:
            info = pltpu.get_tpu_info()
            c = int(getattr(info, "vmem_capacity_bytes", 0) or 0)
            if c > 0:
                cap = c
        except Exception:
            pass
        _VMEM_CAP_CACHE[0] = cap
    return _VMEM_CAP_CACHE[0]


def _vmem_limit(block_shapes, extra_bytes=0):
    """Scoped-VMEM limit sized from the actual blocks (double-buffered) + margin."""
    total = sum(2 * _padded_block_bytes(s) for s in block_shapes) + int(extra_bytes)
    total = 2 * total + (4 << 20)       # headroom for compiler temporaries
    cap = min(128 << 20, _device_vmem_cap())
    return int(min(max(total, 32 << 20), cap))


# ----------------------------------------------------------------------------
# Kernel 1: density map
# ----------------------------------------------------------------------------
def _density_kernel(binx_ref, biny_ref, xattr_ref, yattr_ref, out_ref,
                    *, compute_dtype):
    t = pl.program_id(1)                     # node-tile (reduction) axis, innermost

    @pl.when(t == 0)
    def _():
        out_ref[...] = jnp.zeros_like(out_ref)

    bxlo = binx_ref[:, 0:1]                  # (tm, 1)  bin low edges (x)
    bxhi = binx_ref[:, 1:2]                  # (tm, 1)  bin high edges (x)
    bylo = biny_ref[0:1, :]                  # (1, N)
    byhi = biny_ref[1:2, :]                  # (1, N)

    x = xattr_ref[0:1, :]                    # (1, TN) lane-dense node attrs
    sx = xattr_ref[1:2, :]
    w = xattr_ref[2:3, :]
    y = yattr_ref[:, 0:1]                    # (TN, 1) columnar node attrs
    sy = yattr_ref[:, 1:2]

    # exact rectangle overlap of each node with each bin along x / y
    ox = jnp.maximum(jnp.minimum(x + sx, bxhi) - jnp.maximum(x, bxlo), 0.0)  # (tm, TN)
    oy = jnp.maximum(jnp.minimum(y + sy, byhi) - jnp.maximum(y, bylo), 0.0)  # (TN, N)
    ox = (ox * w).astype(compute_dtype)      # fold per-node weight into the lhs side
    oy = oy.astype(compute_dtype)

    # rho[bx, by] += sum_n w_n ox[bx, n] oy[n, by]   (canonical (M,K)x(K,N) on MXU)
    out_ref[...] += lax.dot_general(ox, oy, (((1,), (0,)), ((), ())),
                                    preferred_element_type=jnp.float32)


def _pack_xattr(x, sx, w, n_pad):
    f32 = jnp.float32
    n = x.shape[0]
    xattr = jnp.zeros((8, n_pad), f32)
    xattr = xattr.at[0, :n].set(x.astype(f32))
    xattr = xattr.at[1, :n].set(sx.astype(f32))
    xattr = xattr.at[2, :n].set(w.astype(f32))
    return xattr


def _pack_yattr(y, sy, n_pad):
    f32 = jnp.float32
    n = y.shape[0]
    yattr = jnp.zeros((n_pad, 2), f32)
    yattr = yattr.at[:n, 0].set(y.astype(f32))
    yattr = yattr.at[:n, 1].set(sy.astype(f32))
    return yattr


def density_map_from_packed(xattr, yattr, bins_x, bins_y, *,
                            tile_n=256, compute_dtype=jnp.float32):
    """Accumulated weighted-overlap map rho[M, N] (no init map, no scaling)."""
    n_pad = xattr.shape[1]
    assert n_pad % tile_n == 0
    M = bins_x.shape[0]
    N = bins_y.shape[1]

    # prefer 256-row tiles: >=2 row tiles for M >= 512 -> megacore split on v7x.
    tile_m = _pick_tile(M, (256, 128, 512, 64, 32, 16, 8))
    grid = (M // tile_m, n_pad // tile_n)

    kernel = functools.partial(_density_kernel, compute_dtype=compute_dtype)
    blocks = [(tile_m, 2), (2, N), (8, tile_n), (tile_n, 2), (tile_m, N)]
    extra = _padded_block_bytes((tile_m, tile_n)) + _padded_block_bytes((tile_n, N))

    return pl.pallas_call(
        kernel,
        out_shape=jax.ShapeDtypeStruct((M, N), jnp.float32),
        grid_spec=pltpu.PrefetchScalarGridSpec(
            num_scalar_prefetch=0,
            grid=grid,
            in_specs=[
                pl.BlockSpec((tile_m, 2), lambda i, t: (i, 0)),   # bin x edges
                pl.BlockSpec((2, N), lambda i, t: (0, 0)),        # bin y edges
                pl.BlockSpec((8, tile_n), lambda i, t: (0, t)),   # x, sx, w
                pl.BlockSpec((tile_n, 2), lambda i, t: (t, 0)),   # y, sy
            ],
            out_specs=pl.BlockSpec((tile_m, N), lambda i, t: (i, 0)),
        ),
        compiler_params=pltpu.CompilerParams(
            dimension_semantics=("parallel", "arbitrary"),
            vmem_limit_bytes=_vmem_limit(blocks, extra)),
    )(bins_x, bins_y, xattr, yattr)


def density_map_pallas(x, y, sx, sy, w, bins_x, bins_y, *,
                       tile_n=256, compute_dtype=jnp.float32):
    n = x.shape[0]
    n_pad = max(tile_n, -(-n // tile_n) * tile_n)
    xattr = _pack_xattr(x, sx, w, n_pad)
    yattr = _pack_yattr(y, sy, n_pad)
    return density_map_from_packed(xattr, yattr, bins_x, bins_y,
                                   tile_n=tile_n, compute_dtype=compute_dtype)


# ----------------------------------------------------------------------------
# Kernel 2a: spectral energy (tiled over spectrum columns, energy-only path)
#   energy = sum(phi * rho) = sum(A^2 * W),  A = unnormalized DCT-II(rho),
#   W = s_u * s_v * inv_wu2_plus_wv2_2X * 2   (s_0 = 0.5, else 1)
# ----------------------------------------------------------------------------
def _energy_kernel(d_ref, cm_ref, cnt_ref, w_ref, e_ref, *, compute_dtype):
    j = pl.program_id(0)

    @pl.when(j == 0)
    def _():
        e_ref[...] = jnp.zeros_like(e_ref)

    d = d_ref[...].astype(compute_dtype)
    cm = cm_ref[...].astype(compute_dtype)
    cnt = cnt_ref[...].astype(compute_dtype)

    t1 = lax.dot_general(d, cnt, (((1,), (0,)), ((), ())),
                         preferred_element_type=jnp.float32)          # (M, tn)
    a = lax.dot_general(cm, t1.astype(compute_dtype), (((1,), (0,)), ((), ())),
                        preferred_element_type=jnp.float32)           # (M, tn)
    e_ref[...] += jnp.sum(a * a * w_ref[...])[None, None]


def spectral_energy_pallas(d, cm, cnT, w_energy, *, compute_dtype=jnp.float32):
    M, N = d.shape
    tn = _pick_tile(N, (512, 256, 128))
    kernel = functools.partial(_energy_kernel, compute_dtype=compute_dtype)
    blocks = [(M, N), (M, M), (N, tn), (M, tn), (1, 1), (M, tn), (M, tn)]
    return pl.pallas_call(
        kernel,
        out_shape=jax.ShapeDtypeStruct((1, 1), jnp.float32),
        grid_spec=pltpu.PrefetchScalarGridSpec(
            num_scalar_prefetch=0,
            grid=(N // tn,),
            in_specs=[
                pl.BlockSpec((M, N), lambda j: (0, 0)),
                pl.BlockSpec((M, M), lambda j: (0, 0)),
                pl.BlockSpec((N, tn), lambda j: (0, j)),
                pl.BlockSpec((M, tn), lambda j: (0, j)),
            ],
            out_specs=pl.BlockSpec((1, 1), lambda j: (0, 0)),
        ),
        compiler_params=pltpu.CompilerParams(
            dimension_semantics=("arbitrary",),
            vmem_limit_bytes=_vmem_limit(blocks)),
    )(d, cm, cnT, w_energy)


# ----------------------------------------------------------------------------
# Kernel 2b: spectral energy + field maps (only when field maps are requested)
# ----------------------------------------------------------------------------
def _spectral_full_kernel(d_ref, cm_ref, cnt_ref, w_ref, wu_ref, wv_ref,
                          smt_ref, cmt_ref, cn_ref, sn_ref,
                          e_ref, fx_ref, fy_ref, *, compute_dtype):
    def mm(a, b):  # canonical (lhs dim 1) x (rhs dim 0) contraction on the MXU
        return lax.dot_general(a.astype(compute_dtype), b.astype(compute_dtype),
                               (((1,), (0,)), ((), ())),
                               preferred_element_type=jnp.float32)

    d = d_ref[...]
    A = mm(cm_ref[...], mm(d, cnt_ref[...]))          # (M, N) unnormalized DCT-II
    # energy = sum(idcct2(a2) * d) == sum(A^2 * W)   (trace / Parseval identity)
    e_ref[...] = jnp.sum(A * A * w_ref[...])[None, None]
    # field maps (idsct2 / idcst2 analogues), stored for the backward pass
    fx_ref[...] = mm(smt_ref[...], mm(A * wu_ref[...], cn_ref[...]))
    fy_ref[...] = mm(cmt_ref[...], mm(A * wv_ref[...], sn_ref[...]))


def spectral_full_pallas(d, cm, cnT, w_energy, w_fx, w_fy, smT, cmT, cn, sn,
                         *, compute_dtype=jnp.float32):
    M, N = d.shape
    full = lambda shp: pl.BlockSpec(shp, lambda j: (0, 0))
    kernel = functools.partial(_spectral_full_kernel, compute_dtype=compute_dtype)
    blocks = ([(M, N)] * 4 + [(M, M)] * 3 + [(N, N)] * 3
              + [(1, 1), (M, N), (M, N)] + [(M, N)] * 3)
    # TODO(synk): tile/split this call (as in spectral_energy_pallas) for num_bins >= 1024 on v7x.
    return pl.pallas_call(
        kernel,
        out_shape=(jax.ShapeDtypeStruct((1, 1), jnp.float32),
                   jax.ShapeDtypeStruct((M, N), jnp.float32),
                   jax.ShapeDtypeStruct((M, N), jnp.float32)),
        grid_spec=pltpu.PrefetchScalarGridSpec(
            num_scalar_prefetch=0,
            grid=(1,),
            in_specs=[full((M, N)), full((M, M)), full((N, N)), full((M, N)),
                      full((M, N)), full((M, N)), full((M, M)), full((M, M)),
                      full((N, N)), full((N, N))],
            out_specs=(full((1, 1)), full((M, N)), full((M, N))),
        ),
        compiler_params=pltpu.CompilerParams(
            vmem_limit_bytes=_vmem_limit(blocks)),
    )(d, cm, cnT, w_energy, w_fx, w_fy, smT, cmT, cn, sn)


# ----------------------------------------------------------------------------
# Module wrapper (mirrors ElectricPotential.__init__/forward glue)
# ----------------------------------------------------------------------------
class ElectricPotentialPallas:
    def __init__(self, node_size_x, node_size_y, bin_center_x, bin_center_y,
                 target_density, xl, yl, xh, yh, bin_size_x, bin_size_y,
                 num_movable_nodes, num_terminals, num_filler_nodes, padding,
                 fast_mode=False, compute_field_maps=False,
                 compute_dtype=jnp.float32, node_tile=256):
        self.node_size_x = node_size_x.astype(jnp.float32)
        self.node_size_y = node_size_y.astype(jnp.float32)
        self.target_density = float(target_density)
        self.xl, self.yl, self.xh, self.yh = float(xl), float(yl), float(xh), float(yh)
        self.bin_size_x, self.bin_size_y = float(bin_size_x), float(bin_size_y)
        self.num_movable_nodes = num_movable_nodes
        self.num_terminals = num_terminals
        self.num_filler_nodes = num_filler_nodes
        self.padding = padding
        self.fast_mode = fast_mode
        self.compute_field_maps = compute_field_maps
        # set compute_dtype=jnp.bfloat16 on v6e/v7x for ~3-4x MXU throughput
        # (validate numerics first); default f32 preserves reference accuracy.
        self.compute_dtype = compute_dtype
        self.node_tile = node_tile

        self.num_bins_x = int(math.ceil((xh - xl) / bin_size_x))
        self.num_bins_y = int(math.ceil((yh - yl) / bin_size_y))
        M, N = self.num_bins_x, self.num_bins_y

        # bin low/high edges precomputed once (lane/sublane friendly layouts)
        self.bin_xlo = bin_center_x.astype(jnp.float32) - 0.5 * self.bin_size_x
        self.bin_ylo = bin_center_y.astype(jnp.float32) - 0.5 * self.bin_size_y
        self.bins_x = jnp.stack([self.bin_xlo, self.bin_xlo + self.bin_size_x], axis=1)  # (M, 2)
        self.bins_y = jnp.stack([self.bin_ylo, self.bin_ylo + self.bin_size_y], axis=0)  # (2, N)

        # frequency weights (same construction as the torch module forward)
        wu = (jnp.arange(M, dtype=jnp.float32) * (2.0 * math.pi / M)).reshape(M, 1)
        wv = (jnp.arange(N, dtype=jnp.float32) * (2.0 * math.pi / N)).reshape(1, N) \
             * (self.bin_size_x / self.bin_size_y)
        wu2_plus_wv2 = wu ** 2 + wv ** 2
        wu2_plus_wv2 = wu2_plus_wv2.at[0, 0].set(1.0)
        inv = 2.0 / wu2_plus_wv2
        inv = inv.at[0, 0].set(0.0)
        self.inv_wu2_plus_wv2_2X = inv
        self.wu_by_wu2_plus_wv2_2X = wu * inv
        self.wv_by_wu2_plus_wv2_2X = wv * inv

        # DCT boundary 0.5 scaling (auv[0,:], auv[:,0]) folded into constant maps
        s_u = jnp.ones((M, 1), jnp.float32).at[0, 0].set(0.5)
        s_v = jnp.ones((1, N), jnp.float32).at[0, 0].set(0.5)
        suv = s_u * s_v
        self.w_energy = suv * inv * 2.0
        self.w_fx = suv * self.wu_by_wu2_plus_wv2_2X
        self.w_fy = suv * self.wv_by_wu2_plus_wv2_2X

        # explicit DCT cosine / sine bases (replace expk/FFT transforms),
        # pre-transposed so every in-kernel matmul is canonical (lhs 1, rhs 0).
        m = jnp.arange(M, dtype=jnp.float32)
        self.cm = jnp.cos(math.pi * m[:, None] * (2.0 * m[None, :] + 1.0) / (2.0 * M))
        self.sm = jnp.sin(math.pi * m[:, None] * (2.0 * m[None, :] + 1.0) / (2.0 * M))
        n = jnp.arange(N, dtype=jnp.float32)
        self.cn = jnp.cos(math.pi * n[:, None] * (2.0 * n[None, :] + 1.0) / (2.0 * N))
        self.sn = jnp.sin(math.pi * n[:, None] * (2.0 * n[None, :] + 1.0) / (2.0 * N))
        self.cmT = self.cm.T
        self.cnT = self.cn.T
        self.smT = self.sm.T

        # e-place cell stretching for movable + filler nodes is position
        # independent -> precompute stretched sizes, area ratios, center
        # offsets and the static rows of the packed attribute slabs once.
        nm, nt = num_movable_nodes, num_terminals
        sqrt2 = 1.414213562
        sxm = jnp.concatenate([self.node_size_x[:nm], self.node_size_x[nm + nt:]])
        sym = jnp.concatenate([self.node_size_y[:nm], self.node_size_y[nm + nt:]])
        sxs = jnp.maximum(sxm, sqrt2 * self.bin_size_x)
        sys_ = jnp.maximum(sym, sqrt2 * self.bin_size_y)
        self._ratio = (sxm * sym) / (sxs * sys_)
        self._dx = 0.5 * (sxm - sxs)                      # stretch around cell center
        self._dy = 0.5 * (sym - sys_)
        self._num_mf = int(sxm.shape[0])
        n_pad = max(self.node_tile, -(-self._num_mf // self.node_tile) * self.node_tile)
        self._n_pad_mf = n_pad
        xattr = jnp.zeros((8, n_pad), jnp.float32)
        xattr = xattr.at[1, :self._num_mf].set(sxs)
        xattr = xattr.at[2, :self._num_mf].set(self._ratio)
        self._xattr_static = xattr                        # row 0 (= x) filled per forward
        yattr = jnp.zeros((n_pad, 2), jnp.float32)
        yattr = yattr.at[:self._num_mf, 1].set(sys_)
        self._yattr_static = yattr                        # col 0 (= y) filled per forward

        self._jit_cache = {}
        self.initial_density_map = None
        self.density_map = None
        self.field_map_x = None
        self.field_map_y = None

    # ---------------- per-forward pipeline (run under one jax.jit) ----------
    def _pack_movable(self, x, y):
        nm, nt = self.num_movable_nodes, self.num_terminals
        nmf = self._num_mf
        xm = jnp.concatenate([x[:nm], x[nm + nt:]])
        ym = jnp.concatenate([y[:nm], y[nm + nt:]])
        xattr = self._xattr_static.at[0, :nmf].set((xm + self._dx).astype(jnp.float32))
        yattr = self._yattr_static.at[:nmf, 0].set((ym + self._dy).astype(jnp.float32))
        return xattr, yattr

    def _impl_density(self, x, y, init_map):
        xattr, yattr = self._pack_movable(x, y)
        rho = density_map_from_packed(xattr, yattr, self.bins_x, self.bins_y,
                                      tile_n=self.node_tile,
                                      compute_dtype=self.compute_dtype)
        # init map + 1/(bin area) scaling as trivial XLA ops (fused under jit,
        # keeps them out of the node loop's resident VMEM).
        return (rho + init_map) * (1.0 / (self.bin_size_x * self.bin_size_y))
        # TODO(synk): padding > 0 bin masking (padding_mask fill) is not implemented.

    def _impl_energy(self, x, y, init_map):
        dmap = self._impl_density(x, y, init_map)
        e = spectral_energy_pallas(dmap, self.cm, self.cnT, self.w_energy,
                                   compute_dtype=self.compute_dtype)
        return dmap, e

    def _impl_full(self, x, y, init_map):
        dmap = self._impl_density(x, y, init_map)
        e, fx, fy = spectral_full_pallas(
            dmap, self.cm, self.cnT, self.w_energy,
            self.w_fx, self.w_fy, self.smT, self.cmT, self.cn, self.sn,
            compute_dtype=self.compute_dtype)
        return dmap, e, fx, fy

    def _get_jitted(self, mode):
        fn = self._jit_cache.get(mode)
        if fn is None:
            impl = {"energy": self._impl_energy,
                    "full": self._impl_full,
                    "density": self._impl_density}[mode]
            fn = jax.jit(impl)
            self._jit_cache[mode] = fn
        return fn

    # ---------------- forward -----------------------------------------------
    def forward(self, pos):
        num_nodes = self.node_size_x.shape[0]
        x = pos[:num_nodes]
        y = pos[num_nodes:]
        nm, nt = self.num_movable_nodes, self.num_terminals
        M, N = self.num_bins_x, self.num_bins_y

        if self.initial_density_map is None:
            if nt > 0:
                wf = jnp.full((nt,), self.target_density, jnp.float32)
                self.initial_density_map = density_map_pallas(
                    x[nm:nm + nt], y[nm:nm + nt],
                    self.node_size_x[nm:nm + nt], self.node_size_y[nm:nm + nt],
                    wf, self.bins_x, self.bins_y,
                    tile_n=self.node_tile, compute_dtype=self.compute_dtype)
            else:
                self.initial_density_map = jnp.zeros((M, N), jnp.float32)

        energy = None
        if self.compute_field_maps:
            dmap, energy, fx, fy = self._get_jitted("full")(x, y, self.initial_density_map)
            self.field_map_x = fx      # analogue of ctx.field_map_x (backward)
            self.field_map_y = fy
        elif not self.fast_mode:
            dmap, energy = self._get_jitted("energy")(x, y, self.initial_density_map)
        else:
            dmap = self._get_jitted("density")(x, y, self.initial_density_map)
        self.density_map = dmap

        if self.fast_mode:
            return jnp.zeros((1,), pos.dtype)
        return energy.reshape(1).astype(pos.dtype)


# ----------------------------------------------------------------------------
# pure-JAX reference (HIGHEST-precision matmuls) for numerical checks
# ----------------------------------------------------------------------------
_HI = jax.lax.Precision.HIGHEST


def _ref_density(x, y, sx, sy, w, bin_xlo, bin_ylo, bsx, bsy):
    ox = jnp.maximum(jnp.minimum(x[:, None] + sx[:, None], bin_xlo[None, :] + bsx)
                     - jnp.maximum(x[:, None], bin_xlo[None, :]), 0.0)
    oy = jnp.maximum(jnp.minimum(y[:, None] + sy[:, None], bin_ylo[None, :] + bsy)
                     - jnp.maximum(y[:, None], bin_ylo[None, :]), 0.0)
    return jnp.einsum('nm,nk->mk', ox * w[:, None], oy, precision=_HI)


def _reference_forward(ep, pos):
    mm = functools.partial(jnp.matmul, precision=_HI)
    num_nodes = ep.node_size_x.shape[0]
    x, y = pos[:num_nodes], pos[num_nodes:]
    nm, nt = ep.num_movable_nodes, ep.num_terminals
    if nt > 0:
        init = _ref_density(x[nm:nm + nt], y[nm:nm + nt],
                            ep.node_size_x[nm:nm + nt], ep.node_size_y[nm:nm + nt],
                            jnp.full((nt,), ep.target_density, jnp.float32),
                            ep.bin_xlo, ep.bin_ylo, ep.bin_size_x, ep.bin_size_y)
    else:
        init = jnp.zeros((ep.num_bins_x, ep.num_bins_y), jnp.float32)
    sqrt2 = 1.414213562
    xm = jnp.concatenate([x[:nm], x[nm + nt:]])
    ym = jnp.concatenate([y[:nm], y[nm + nt:]])
    sxm = jnp.concatenate([ep.node_size_x[:nm], ep.node_size_x[nm + nt:]])
    sym = jnp.concatenate([ep.node_size_y[:nm], ep.node_size_y[nm + nt:]])
    sxs = jnp.maximum(sxm, sqrt2 * ep.bin_size_x)
    sys_ = jnp.maximum(sym, sqrt2 * ep.bin_size_y)
    ratio = (sxm * sym) / (sxs * sys_)
    d = _ref_density(xm + 0.5 * (sxm - sxs), ym + 0.5 * (sym - sys_),
                     sxs, sys_, ratio, ep.bin_xlo, ep.bin_ylo,
                     ep.bin_size_x, ep.bin_size_y)
    d = (d + init) / (ep.bin_size_x * ep.bin_size_y)

    auv = mm(mm(ep.cm, d), ep.cn.T)
    auv = auv.at[0, :].mul(0.5)
    auv = auv.at[:, 0].mul(0.5)
    phi = mm(mm(ep.cm.T, auv * ep.inv_wu2_plus_wv2_2X * 2.0), ep.cn)
    energy = jnp.sum(phi * d).reshape(1)
    fx = mm(mm(ep.sm.T, auv * ep.wu_by_wu2_plus_wv2_2X), ep.cn)
    fy = mm(mm(ep.cm.T, auv * ep.wv_by_wu2_plus_wv2_2X), ep.sn)
    return d, energy, fx, fy


# ----------------------------------------------------------------------------
if __name__ == "__main__":
    key = jax.random.PRNGKey(0)
    k1, k2, k3, k4 = jax.random.split(key, 4)

    xl, yl, xh, yh = 0.0, 0.0, 32.0, 32.0
    bin_size_x = bin_size_y = 1.0
    num_movable, num_terminals, num_filler = 96, 16, 48
    num_nodes = num_movable + num_terminals + num_filler

    node_size_x = jax.random.uniform(k1, (num_nodes,), jnp.float32, 0.5, 2.5)
    node_size_y = jax.random.uniform(k2, (num_nodes,), jnp.float32, 0.5, 2.5)

    M = int(math.ceil((xh - xl) / bin_size_x))
    N = int(math.ceil((yh - yl) / bin_size_y))
    bin_center_x = xl + (jnp.arange(M, dtype=jnp.float32) + 0.5) * bin_size_x
    bin_center_y = yl + (jnp.arange(N, dtype=jnp.float32) + 0.5) * bin_size_y

    pos_x = jax.random.uniform(k3, (num_nodes,), jnp.float32, xl, xh - 3.0)
    pos_y = jax.random.uniform(k4, (num_nodes,), jnp.float32, yl, yh - 3.0)
    pos = jnp.concatenate([pos_x, pos_y])   # [x positions ; y positions]

    common = dict(node_size_x=node_size_x, node_size_y=node_size_y,
                  bin_center_x=bin_center_x, bin_center_y=bin_center_y,
                  target_density=0.9, xl=xl, yl=yl, xh=xh, yh=yh,
                  bin_size_x=bin_size_x, bin_size_y=bin_size_y,
                  num_movable_nodes=num_movable, num_terminals=num_terminals,
                  num_filler_nodes=num_filler, padding=0, fast_mode=False)

    def _close(a, b, rtol=2e-3):
        atol = rtol * float(jnp.max(jnp.abs(b))) + 1e-5
        return bool(jnp.allclose(a, b, rtol=rtol, atol=atol))

    # 1) full path: energy + field maps (exercises the fused spectral kernel)
    ep = ElectricPotentialPallas(compute_field_maps=True, **common)
    energy = ep.forward(pos)
    jax.block_until_ready(energy)

    d_ref, e_ref, fx_ref, fy_ref = _reference_forward(ep, pos)
    assert energy.shape == (1,) and energy.dtype == jnp.float32
    assert _close(ep.density_map, d_ref), "density map mismatch"
    assert _close(energy, e_ref), (energy, e_ref)
    assert _close(ep.field_map_x, fx_ref), "field_map_x mismatch"
    assert _close(ep.field_map_y, fy_ref), "field_map_y mismatch"

    # 2) default lean path: energy only (tiled spectral kernel, no field maps)
    ep2 = ElectricPotentialPallas(compute_field_maps=False, **common)
    energy2 = ep2.forward(pos)
    jax.block_until_ready(energy2)
    assert _close(energy2, e_ref), (energy2, e_ref)

    print("KERNEL_OK")
</pallas_src>

<mosaic_0001>
module attributes {stable_mosaic.version = 11 : i64} {
  func.func @_density_kernel(%arg0: i32, %arg1: i32, %arg2: memref<32x2xf32, #tpu.memory_space<vmem>>, %arg3: memref<2x32xf32, #tpu.memory_space<vmem>>, %arg4: memref<8x256xf32, #tpu.memory_space<vmem>>, %arg5: memref<256x2xf32, #tpu.memory_space<vmem>>, %arg6: memref<32x32xf32, #tpu.memory_space<vmem>>) attributes {dimension_semantics = [#tpu.dimension_semantics<parallel>, #tpu.dimension_semantics<arbitrary>], iteration_bounds = array<i64: 1, 1>, scalar_prefetch = 0 : i64, scratch_operands = 0 : i64, tpu.core_type = #tpu.core_type<tc>, window_params = [{transform_indices = @transform_0, window_bounds = array<i64: 32, 2>}, {pipeline_mode = #tpu.pipeline_mode<synchronous>, transform_indices = @transform_1, window_bounds = array<i64: 2, 32>}, {transform_indices = @transform_2, window_bounds = array<i64: 8, 256>}, {transform_indices = @transform_3, window_bounds = array<i64: 256, 2>}, {transform_indices = @transform_4, window_bounds = array<i64: 32, 32>}]} {
    %c0_i32 = arith.constant 0 : i32
    %0 = arith.cmpi eq, %arg1, %c0_i32 : i32
    %1 = arith.extui %0 : i1 to i32
    %c0_i32_0 = arith.constant 0 : i32
    %2 = arith.cmpi ne, %1, %c0_i32_0 : i32
    scf.if %2 {
      %cst_22 = arith.constant 0.000000e+00 : f32
      %38 = vector.broadcast %cst_22 : f32 to vector<32x32xf32>
      %c0_23 = arith.constant 0 : index
      %c0_24 = arith.constant 0 : index
      %39 = vector.load %arg6[%c0_23, %c0_24] : memref<32x32xf32, #tpu.memory_space<vmem>>, vector<32x32xf32>
      tpu.vector_store %arg6[%c0_23, %c0_24], %38 {strides = array<i32>} : memref<32x32xf32, #tpu.memory_space<vmem>>, vector<32x32xf32>,
    } else {
    }
    %c0 = arith.constant 0 : index
    %c0_1 = arith.constant 0 : index
    %3 = vector.load %arg2[%c0, %c0_1] : memref<32x2xf32, #tpu.memory_space<vmem>>, vector<32x1xf32>
    %c0_2 = arith.constant 0 : index
    %c1 = arith.constant 1 : index
    %4 = vector.load %arg2[%c0_2, %c1] : memref<32x2xf32, #tpu.memory_space<vmem>>, vector<32x1xf32>
    %c0_3 = arith.constant 0 : index
    %c0_4 = arith.constant 0 : index
    %5 = vector.load %arg3[%c0_3, %c0_4] : memref<2x32xf32, #tpu.memory_space<vmem>>, vector<1x32xf32>
    %c1_5 = arith.constant 1 : index
    %c0_6 = arith.constant 0 : index
    %6 = vector.load %arg3[%c1_5, %c0_6] : memref<2x32xf32, #tpu.memory_space<vmem>>, vector<1x32xf32>
    %c0_7 = arith.constant 0 : index
    %c0_8 = arith.constant 0 : index
    %7 = vector.load %arg4[%c0_7, %c0_8] : memref<8x256xf32, #tpu.memory_space<vmem>>, vector<1x256xf32>
    %c1_9 = arith.constant 1 : index
    %c0_10 = arith.constant 0 : index
    %8 = vector.load %arg4[%c1_9, %c0_10] : memref<8x256xf32, #tpu.memory_space<vmem>>, vector<1x256xf32>
    %c2 = arith.constant 2 : index
    %c0_11 = arith.constant 0 : index
    %9 = vector.load %arg4[%c2, %c0_11] : memref<8x256xf32, #tpu.memory_space<vmem>>, vector<1x256xf32>
    %c0_12 = arith.constant 0 : index
    %c0_13 = arith.constant 0 : index
    %10 = vector.load %arg5[%c0_12, %c0_13] : memref<256x2xf32, #tpu.memory_space<vmem>>, vector<256x1xf32>
    %c0_14 = arith.constant 0 : index
    %c1_15 = arith.constant 1 : index
    %11 = vector.load %arg5[%c0_14, %c1_15] : memref<256x2xf32, #tpu.memory_space<vmem>>, vector<256x1xf32>
    %12 = arith.addf %7, %8 : vector<1x256xf32>
    %13 = vector.broadcast %12 : vector<1x256xf32> to vector<32x256xf32>
    %14 = vector.broadcast %4 : vector<32x1xf32> to vector<32x256xf32>
    %15 = arith.minimumf %13, %14 : vector<32x256xf32>
    %16 = vector.broadcast %7 : vector<1x256xf32> to vector<32x256xf32>
    %17 = vector.broadcast %3 : vector<32x1xf32> to vector<32x256xf32>
    %18 = arith.maximumf %16, %17 : vector<32x256xf32>
    %19 = arith.subf %15, %18 : vector<32x256xf32>
    %cst = arith.constant 0.000000e+00 : f32
    %20 = vector.broadcast %cst : f32 to vector<32x256xf32>
    %21 = arith.maximumf %19, %20 : vector<32x256xf32>
    %22 = arith.addf %10, %11 : vector<256x1xf32>
    %23 = vector.broadcast %22 : vector<256x1xf32> to vector<256x32xf32>
    %24 = vector.broadcast %6 : vector<1x32xf32> to vector<256x32xf32>
    %25 = arith.minimumf %23, %24 : vector<256x32xf32>
    %26 = vector.broadcast %10 : vector<256x1xf32> to vector<256x32xf32>
    %27 = vector.broadcast %5 : vector<1x32xf32> to vector<256x32xf32>
    %28 = arith.maximumf %26, %27 : vector<256x32xf32>
    %29 = arith.subf %25, %28 : vector<256x32xf32>
    %cst_16 = arith.constant 0.000000e+00 : f32
    %30 = vector.broadcast %cst_16 : f32 to vector<256x32xf32>
    %31 = arith.maximumf %29, %30 : vector<256x32xf32>
    %32 = vector.broadcast %9 : vector<1x256xf32> to vector<32x256xf32>
    %33 = arith.mulf %21, %32 : vector<32x256xf32>
    %c0_17 = arith.constant 0 : index
    %c0_18 = arith.constant 0 : index
    %34 = vector.load %arg6[%c0_17, %c0_18] : memref<32x32xf32, #tpu.memory_space<vmem>>, vector<32x32xf32>
    %cst_19 = arith.constant dense<0.000000e+00> : vector<32x32xf32>
    %35 = tpu.matmul %33, %31, %cst_19 {dimension_numbers = #tpu.dot_dimension_numbers<[1], [0], [0], [1], [0, 0, 1, 1], [], []>} : vector<32x256xf32>, vector<256x32xf32>, vector<32x32xf32> -> vector<32x32xf32>
    %36 = arith.addf %34, %35 : vector<32x32xf32>
    %c0_20 = arith.constant 0 : index
    %c0_21 = arith.constant 0 : index
    %37 = vector.load %arg6[%c0_20, %c0_21] : memref<32x32xf32, #tpu.memory_space<vmem>>, vector<32x32xf32>
    tpu.vector_store %arg6[%c0_20, %c0_21], %36 {strides = array<i32>} : memref<32x32xf32, #tpu.memory_space<vmem>>, vector<32x32xf32>,
    return
  }
  func.func @transform_0(%arg0: i32, %arg1: i32) -> (i32, i32) {
    %c0_i32 = arith.constant 0 : i32
    %c0_i32_0 = arith.constant 0 : i32
    return %arg0, %c0_i32 : i32, i32
  }
  func.func @transform_1(%arg0: i32, %arg1: i32) -> (i32, i32) {
    %c0_i32 = arith.constant 0 : i32
    %c0_i32_0 = arith.constant 0 : i32
    %c0_i32_1 = arith.constant 0 : i32
    return %c0_i32, %c0_i32_0 : i32, i32
  }
  func.func @transform_2(%arg0: i32, %arg1: i32) -> (i32, i32) {
    %c0_i32 = arith.constant 0 : i32
    %c0_i32_0 = arith.constant 0 : i32
    return %c0_i32, %arg1 : i32, i32
  }
  func.func @transform_3(%arg0: i32, %arg1: i32) -> (i32, i32) {
    %c0_i32 = arith.constant 0 : i32
    %c0_i32_0 = arith.constant 0 : i32
    return %arg1, %c0_i32 : i32, i32
  }
  func.func @transform_4(%arg0: i32, %arg1: i32) -> (i32, i32) {
    %c0_i32 = arith.constant 0 : i32
    %c0_i32_0 = arith.constant 0 : i32
    return %arg0, %c0_i32 : i32, i32
  }
}

</mosaic_0001>

<bundles_post_ra>
// kernel: tpu_custom_call.1
= control target key start
LH: loop header
LB: loop body
LE: loop exit
PB: predicated region body
PF: predicated region fallthrough
CT: control target
= control target key end

     0   :  { %s1013_s19 = smov 127   ;;  %v1014_v4 = vmov 0   ;;  %s1471_s0 = inlined_call_operand.vmem [shape: f32[32,2], index: 0, kind: input, shape index: {}]   ;;  %s1472_s1 = inlined_call_operand.vmem [shape: f32[2,32], index: 1, kind: input, shape index: {}]   ;;  %s1473_s2 = inlined_call_operand.vmem [shape: f32[8,256], index: 2, kind: input, shape index: {}]   ;;  %s1474_s3 = inlined_call_operand.vmem [shape: f32[256,2], index: 3, kind: input, shape index: {}]   ;;  %s1475_s4 = inlined_call_operand.hbm [shape: f32[32,32], index: 4, kind: output, shape index: {}]  }
   0x1   :  { %v1048_v0 = vld [vmem:[%s1474_s3 + $0x80] sm:$0xff]  ;;  %v1062_v2 = vld [vmem:[%s1474_s3 + $0x88] sm:$0xff]  ;;  %981 = vset.pattern.permute.xlu1 %v1014_v4  ;;  %982 = vset.pattern.permute.xlu0 %v1014_v4  ;;  %v1078_v5 = vld [vmem:[%s1474_s3 + $0x98] sm:$0xff] }
   0x2   :  { %v1053_v1 = vld [vmem:[%s1474_s3] sm:$0xff]  ;;  %225 = vrot.lane.b32.xlu0 %v1048_v0, %s1013_s19  ;;  %v1067_v3 = vld [vmem:[%s1474_s3 + $0x8] sm:$0xff]  ;;  %v1083_v6 = vld [vmem:[%s1474_s3 + $0x90] sm:$0xff] }
   0x3   :  { %193 = vrot.lane.b32.xlu1 %v1053_v1, %s1013_s19  ;;  %v1092_v7 = vld [vmem:[%s1474_s3 + $0x18] sm:$0xff]  ;;  %v1097_v8 = vld [vmem:[%s1474_s3 + $0x10] sm:$0xff] }
   0x6   :  { %227 = vrot.lane.b32.xlu0 %v1062_v2, %s1013_s19 }
   0x7   :  { %195 = vrot.lane.b32.xlu1 %v1067_v3, %s1013_s19 }
   0xa   :  { %229 = vrot.lane.b32.xlu0 %v1083_v6, %s1013_s19 }
   0xb   :  { %231 = vrot.lane.b32.xlu1 %v1078_v5, %s1013_s19 }
   0xc   :  { %9 = vsyncpa [#allocation3], 0  ;;  %v1106_v9 = vld [vmem:[%s1474_s3 + $0xa8] sm:$0xff]  ;;  %v1111_v10 = vld [vmem:[%s1474_s3 + $0xa0] sm:$0xff]  ;;  %vm22_vm0 = vcmask 261120  }
   0xd   :  { %v1120_v11 = vld [vmem:[%s1474_s3 + $0x28] sm:$0xff]  ;;  %v1125_v12 = vld [vmem:[%s1474_s3 + $0x20] sm:$0xff]  ;;  %v1134_v13 = vld [vmem:[%s1474_s3 + $0xb8] sm:$0xff] }
   0xe   :  { %197 = vrot.lane.b32.xlu0 %v1097_v8, %s1013_s19  ;;  %v1139_v14 = vld [vmem:[%s1474_s3 + $0xb0] sm:$0xff]  ;;  %v1153_v16 = vld [vmem:[%s1474_s3 + $0x38] sm:$0xff]  ;;  %v1162_v17 = vld [vmem:[%s1474_s3 + $0xc8] sm:$0xff] }
   0xf   :  { %199 = vrot.lane.b32.xlu1 %v1092_v7, %s1013_s19  ;;  %v1148_v15 = vld [vmem:[%s1474_s3 + $0x30] sm:$0xff]  ;;  %v1167_v18 = vld [vmem:[%s1474_s3 + $0xc0] sm:$0xff]  ;;  %v1176_v19 = vld [vmem:[%s1474_s3 + $0x48] sm:$0xff] }
  0x10   :  { %v1181_v20 = vld [vmem:[%s1474_s3 + $0x40] sm:$0xff]  ;;  %v1190_v21 = vld [vmem:[%s1474_s3 + $0xd8] sm:$0xff]  ;;  %v1195_v22 = vld [vmem:[%s1474_s3 + $0xd0] sm:$0xff] }
  0x11   :  { %v1204_v23 = vld [vmem:[%s1474_s3 + $0x58] sm:$0xff]  ;;  %v1209_v24 = vld [vmem:[%s1474_s3 + $0x50] sm:$0xff]  ;;  %v1218_v25 = vld [vmem:[%s1474_s3 + $0xe8] sm:$0xff] }
  0x12   :  { %233 = vrot.lane.b32.xlu0 %v1111_v10, %s1013_s19  ;;  %v1223_v26 = vld [vmem:[%s1474_s3 + $0xe0] sm:$0xff]  ;;  %v1232_v27 = vld [vmem:[%s1474_s3 + $0x68] sm:$0xff]  ;;  %v1246_v29 = vld [vmem:[%s1474_s3 + $0xf8] sm:$0xff] }
  0x13   :  { %235 = vrot.lane.b32.xlu1 %v1106_v9, %s1013_s19  ;;  %v1237_v28 = vld [vmem:[%s1474_s3 + $0x60] sm:$0xff]  ;;  %v1251_v30 = vld [vmem:[%s1474_s3 + $0xf0] sm:$0xff]  ;;  %v1260_v31 = vld [vmem:[%s1474_s3 + $0x78] sm:$0xff] }
  0x14   :  { %v1265_v32 = vld [vmem:[%s1474_s3 + $0x70] sm:$0xff] }
  0x16   :  { %201 = vrot.lane.b32.xlu0 %v1125_v12, %s1013_s19 }
  0x17   :  { %203 = vrot.lane.b32.xlu1 %v1120_v11, %s1013_s19 }
  0x1a   :  { %237 = vrot.lane.b32.xlu0 %v1139_v14, %s1013_s19 }
  0x1b   :  { %239 = vrot.lane.b32.xlu1 %v1134_v13, %s1013_s19 }
  0x1e   :  { %205 = vrot.lane.b32.xlu0 %v1148_v15, %s1013_s19 }
  0x1f   :  { %207 = vrot.lane.b32.xlu1 %v1153_v16, %s1013_s19 }
  0x22   :  { %241 = vrot.lane.b32.xlu0 %v1167_v18, %s1013_s19 }
  0x23   :  { %243 = vrot.lane.b32.xlu1 %v1162_v17, %s1013_s19 }
  0x26   :  { %209 = vrot.lane.b32.xlu0 %v1181_v20, %s1013_s19 }
  0x27   :  { %211 = vrot.lane.b32.xlu1 %v1176_v19, %s1013_s19 }
  0x2a   :  { %245 = vrot.lane.b32.xlu0 %v1195_v22, %s1013_s19 }
  0x2b   :  { %247 = vrot.lane.b32.xlu1 %v1190_v21, %s1013_s19 }
  0x2e   :  { %213 = vrot.lane.b32.xlu0 %v1209_v24, %s1013_s19 }
  0x2f   :  { %215 = vrot.lane.b32.xlu1 %v1204_v23, %s1013_s19 }
  0x32   :  { %249 = vrot.lane.b32.xlu0 %v1223_v26, %s1013_s19 }
  0x33   :  { %251 = vrot.lane.b32.xlu1 %v1218_v25, %s1013_s19 }
  0x36   :  { %217 = vrot.lane.b32.xlu0 %v1237_v28, %s1013_s19 }
  0x37   :  { %219 = vrot.lane.b32.xlu1 %v1232_v27, %s1013_s19 }
  0x3a   :  { %253 = vrot.lane.b32.xlu0 %v1251_v30, %s1013_s19 }
  0x3b   :  { %255 = vrot.lane.b32.xlu1 %v1246_v29, %s1013_s19 }
  0x3e   :  { %221 = vrot.lane.b32.xlu0 %v1265_v32, %s1013_s19 }
  0x3f   :  { %223 = vrot.lane.b32.xlu1 %v1260_v31, %s1013_s19 }
  0x42   :  { %586 = vperm.xlu0 %982, %v1062_v2  }
  0x43   :  { %582 = vperm.xlu1 %981, %v1048_v0  }
  0x46   :  { %522 = vperm.xlu0 %982, %v1067_v3  }
  0x47   :  { %518 = vperm.xlu1 %981, %v1053_v1  }
  0x4a   :  { %594 = vperm.xlu0 %982, %v1078_v5  }
  0x4b   :  { %590 = vperm.xlu1 %981, %v1083_v6  }
  0x4e   :  { %530 = vperm.xlu0 %982, %v1092_v7  }
  0x4f   :  { %526 = vperm.xlu1 %981, %v1097_v8  }
  0x52   :  { %602 = vperm.xlu0 %982, %v1106_v9  }
  0x53   :  { %598 = vperm.xlu1 %981, %v1111_v10  }
  0x56   :  { %538 = vperm.xlu0 %982, %v1120_v11  }
  0x57   :  { %534 = vperm.xlu1 %981, %v1125_v12  }
  0x5b   :  { %606 = vperm.xlu1 %981, %v1139_v14  }
  0x74   :  { %v226_v33 = vpop.permute.xlu0 %225 }
  0x75   :  { %v194_v34 = vpop.permute.xlu1 %193  ;;  %v305_v35 = vadd.f32 %v226_v33, %v1048_v0 }
  0x76   :  { %v289_v40 = vadd.f32 %v194_v34, %v1053_v1 }
  0x77   :  { %403 = vperm.xlu0 %982, %v305_v35  }
  0x78   :  { %v228_v36 = vpop.permute.xlu0 %227 }
  0x79   :  { %v196_v37 = vpop.permute.xlu1 %195  ;;  %v306_v38 = vadd.f32 %v228_v36, %v1062_v2 }
  0x7a   :  { %v290_v39 = vadd.f32 %v196_v37, %v1067_v3 }
  0x7b   :  { %408 = vperm.xlu1 %981, %v306_v38  }
  0x7c   :  { %328 = vperm.xlu0 %982, %v290_v39   ;;  %v230_v42 = vpop.permute.xlu0 %229 }
  0x7d   :  { %v232_v41 = vpop.permute.xlu1 %231  ;;  %v307_v44 = vadd.f32 %v230_v42, %v1083_v6  ;;  %v29_v42 = vld [vmem:[%s1471_s0 + $0x10] sm:$0xff] }
  0x7e   :  { %v308_v43 = vadd.f32 %v232_v41, %v1078_v5 }
  0x7f   :  { %323 = vperm.xlu1 %981, %v289_v40  }
  0x80   :  { %418 = vperm.xlu0 %982, %v308_v43   ;;  %v198_v46 = vpop.permute.xlu0 %197  ;;  %v1015_v43 = vmov 1  }
  0x81   :  { %v200_v45 = vpop.permute.xlu1 %199  ;;  %v291_v48 = vadd.f32 %v198_v46, %v1097_v8 }
  0x82   :  { %v292_v47 = vadd.f32 %v200_v45, %v1092_v7 }
  0x83   :  { %413 = vperm.xlu1 %981, %v307_v44  }
  0x84   :  { %338 = vperm.xlu0 %982, %v292_v47   ;;  %v234_v50 = vpop.permute.xlu0 %233  ;;  %v30_v47 = vld [vmem:[%s1471_s0 + $0x18] sm:$0xff] }
  0x85   :  { %v236_v49 = vpop.permute.xlu1 %235  ;;  %v309_v52 = vadd.f32 %v234_v50, %v1111_v10 }
  0x86   :  { %v310_v51 = vadd.f32 %v236_v49, %v1106_v9 }
  0x87   :  { %333 = vperm.xlu1 %981, %v291_v48  }
  0x88   :  { %428 = vperm.xlu0 %982, %v310_v51   ;;  %v202_v54 = vpop.permute.xlu0 %201  ;;  %v1363_v51 = vld [vmem:[%s1472_s1 + $0x1] ss:$0 sm:$0xff] }
  0x89   :  { %v204_v53 = vpop.permute.xlu1 %203  ;;  %v293_v56 = vadd.f32 %v202_v54, %v1125_v12 }
  0x8a   :  { %v294_v55 = vadd.f32 %v204_v53, %v1120_v11 }
  0x8b   :  { %423 = vperm.xlu1 %981, %v309_v52   ;;  %v1368_v52 = vld [vmem:[%s1472_s1] ss:$0 sm:$0xff] }
  0x8c   :  { %348 = vperm.xlu0 %982, %v294_v55   ;;  %v238_v58 = vpop.permute.xlu0 %237 }
  0x8d   :  { %v240_v57 = vpop.permute.xlu1 %239  ;;  %v311_v60 = vadd.f32 %v238_v58, %v1139_v14 }
  0x8e   :  { %v312_v59 = vadd.f32 %v240_v57, %v1134_v13 }
  0x8f   :  { %343 = vperm.xlu1 %981, %v293_v56  }
  0x90   :  { %438 = vperm.xlu0 %982, %v312_v59   ;;  %v206_v61 = vpop.permute.xlu0 %205 }
  0x91   :  { %v208_v62 = vpop.permute.xlu1 %207  ;;  %v295_v63 = vadd.f32 %v206_v61, %v1148_v15 }
  0x92   :  { %v296_v0 = vadd.f32 %v208_v62, %v1153_v16 }
  0x93   :  { %433 = vperm.xlu1 %981, %v311_v60  }
  0x94   :  { %610 = vperm.xlu0 %982, %v1134_v13   ;;  %v242_v1 = vpop.permute.xlu0 %241 }
  0x95   :  { %v244_v2 = vpop.permute.xlu1 %243  ;;  %v313_v3 = vadd.f32 %v242_v1, %v1167_v18 }
  0x96   :  { %v314_v5 = vadd.f32 %v244_v2, %v1162_v17 }
  0x97   :  { %353 = vperm.xlu1 %981, %v295_v63  }
  0x98   :  { %358 = vperm.xlu0 %982, %v296_v0   ;;  %v210_v6 = vpop.permute.xlu0 %209 }
  0x99   :  { %v212_v7 = vpop.permute.xlu1 %211  ;;  %v297_v8 = vadd.f32 %v210_v6, %v1181_v20 }
  0x9a   :  { %v298_v9 = vadd.f32 %v212_v7, %v1176_v19 }
  0x9b   :  { %542 = vperm.xlu1 %981, %v1148_v15  }
  0x9c   :  { %546 = vperm.xlu0 %982, %v1153_v16   ;;  %v246_v10 = vpop.permute.xlu0 %245 }
  0x9d   :  { %v248_v11 = vpop.permute.xlu1 %247  ;;  %v315_v12 = vadd.f32 %v246_v10, %v1195_v22 }
  0x9e   :  { %v316_v13 = vadd.f32 %v248_v11, %v1190_v21 }
  0x9f   :  { %443 = vperm.xlu1 %981, %v313_v3  }
  0xa0   :  { %448 = vperm.xlu0 %982, %v314_v5   ;;  %v214_v14 = vpop.permute.xlu0 %213 }
  0xa1   :  { %v216_v15 = vpop.permute.xlu1 %215 }
  0xa2   :  { %v300_v16 = vadd.f32 %v216_v15, %v1204_v23 }
  0xa3   :  { %614 = vperm.xlu1 %981, %v1167_v18  }
  0xa4   :  { %618 = vperm.xlu0 %982, %v1162_v17   ;;  %v299_v17 = vadd.f32 %v214_v14, %v1209_v24  ;;  %v250_v18 = vpop.permute.xlu0 %249 }
  0xa5   :  { %v317_v33 = vadd.f32 %v250_v18, %v1223_v26 }
  0xa7   :  { %363 = vperm.xlu1 %981, %v297_v8  }
  0xa8   :  { %368 = vperm.xlu0 %982, %v298_v9  }
  0xab   :  { %550 = vperm.xlu1 %981, %v1181_v20  }
  0xac   :  { %554 = vperm.xlu0 %982, %v1176_v19   ;;  %v252_v19 = vpop.permute.xlu1 %251 }
  0xad   :  { %v318_v20 = vadd.f32 %v252_v19, %v1218_v25 }
  0xaf   :  { %453 = vperm.xlu1 %981, %v315_v12  }
  0xb0   :  { %458 = vperm.xlu0 %982, %v316_v13   ;;  %v220_v34 = vpop.permute.xlu1 %219 }
  0xb3   :  { %622 = vperm.xlu1 %981, %v1195_v22   ;;  %v218_v22 = vpop.permute.xlu0 %217 }
  0xb4   :  { %626 = vperm.xlu0 %982, %v1190_v21   ;;  %v302_v21 = vadd.f32 %v220_v34, %v1232_v27  ;;  %v301_v35 = vadd.f32 %v218_v22, %v1237_v28  ;;  %v256_v36 = vpop.permute.xlu1 %255 }
  0xb5   :  { %v320_v38 = vadd.f32 %v256_v36, %v1246_v29 }
  0xb7   :  { %373 = vperm.xlu1 %981, %v299_v17  }
  0xb8   :  { %378 = vperm.xlu0 %982, %v300_v16   ;;  %v224_v37 = vpop.permute.xlu1 %223 }
  0xbb   :  { %558 = vperm.xlu1 %981, %v1209_v24   ;;  %v254_v24 = vpop.permute.xlu0 %253 }
  0xbc   :  { %562 = vperm.xlu0 %982, %v1204_v23   ;;  %v319_v23 = vadd.f32 %v254_v24, %v1251_v30 }
  0xbf   :  { %463 = vperm.xlu1 %981, %v317_v33   ;;  %v222_v39 = vpop.permute.xlu0 %221 }
  0xc0   :  { %468 = vperm.xlu0 %982, %v318_v20  }
  0xc3   :  { %630 = vperm.xlu1 %981, %v1223_v26   ;;  %v583_v26 = vpop.permute.xlu1 %582  ;;  %v587_v40 = vpop.permute.xlu0 %586 }
  0xc4   :  { %634 = vperm.xlu0 %982, %v1218_v25   ;;  %v303_v25 = vadd.f32 %v222_v39, %v1265_v32  ;;  %v665_v56 = vmax.f32 %v583_v26, %v1368_v52  ;;  %v666_v58 = vmax.f32 %v587_v40, %v1368_v52 }
  0xc7   :  { %383 = vperm.xlu1 %981, %v301_v35   ;;  %v523_v41 = vpop.permute.xlu0 %522 }
  0xc8   :  { %388 = vperm.xlu0 %982, %v302_v21   ;;  %v650_v62 = vmax.f32 %v523_v41, %v1368_v52 }
  0xcb   :  { %566 = vperm.xlu1 %981, %v1237_v28   ;;  %v304_v28 = vadd.f32 %v224_v37, %v1260_v31  ;;  %v595_v44 = vpop.permute.xlu0 %594 }
  0xcc   :  { %570 = vperm.xlu0 %982, %v1232_v27   ;;  %v519_v27 = vpop.permute.xlu1 %518  ;;  %v668_v9 = vmax.f32 %v595_v44, %v1368_v52 }
  0xcd   :  { %v649_v0 = vmax.f32 %v519_v27, %v1368_v52 }
  0xcf   :  { %473 = vperm.xlu1 %981, %v319_v23   ;;  %v531_v45 = vpop.permute.xlu0 %530 }
  0xd0   :  { %478 = vperm.xlu0 %982, %v320_v38   ;;  %v652_v20 = vmax.f32 %v531_v45, %v1368_v52 }
  0xd3   :  { %638 = vperm.xlu1 %981, %v1251_v30   ;;  %v27_v30 = vld [vmem:[%s1471_s0] sm:$0xff]  ;;  %v1353_v48 = vpop.permute.xlu0 %602 }
  0xd4   :  { %642 = vperm.xlu0 %982, %v1246_v29   ;;  %v591_v29 = vpop.permute.xlu1 %590  ;;  %v670_v39 = vmax.f32 %v1353_v48, %v1368_v52 }
  0xd5   :  { %v667_v12 = vmax.f32 %v591_v29, %v1368_v52 }
  0xd7   :  { %393 = vperm.xlu1 %981, %v303_v25   ;;  %v1357_v50 = vpop.permute.xlu0 %538 }
  0xd8   :  { %398 = vperm.xlu0 %982, %v304_v28   ;;  %v654_v44 = vmax.f32 %v1357_v50, %v1368_v52 }
  0xdb   :  { %574 = vperm.xlu1 %981, %v1265_v32   ;;  %v28_v32 = vld [vmem:[%s1471_s0 + $0x8] sm:$0xff] }
  0xdc   :  { %578 = vperm.xlu0 %982, %v1260_v31   ;;  %v1344_v31 = vpop.permute.xlu1 %526 }
  0xdd   :  { %v651_v22 = vmax.f32 %v1344_v31, %v1368_v52 }
  0xdf   :  { %983 = vset.pattern.permute.xlu1 %v1015_v43 }
  0xe0   :  { %984 = vset.pattern.permute.xlu0 %v1015_v43  ;;  %84 = vperm.xlu1 %983, %v27_v30   ;;  %v1348_v46 = vpop.permute.xlu1 %598 }
  0xe1   :  { %94 = vperm.xlu0 %984, %v29_v42   ;;  %v669_v40 = vmax.f32 %v1348_v46, %v1368_v52 }
  0xe4   :  { %985 = vset.pattern.permute.xlu1 %v1014_v4  ;;  %v1355_v49 = vpop.permute.xlu1 %534 }
  0xe5   :  { %89 = vperm.xlu0 %984, %v28_v32   ;;  %122 = vperm.xlu1 %985, %v27_v30   ;;  %v653_v46 = vmax.f32 %v1355_v49, %v1368_v52 }
  0xe8   :  { %v1370_v53 = vpop.permute.xlu1 %606 }
  0xe9   :  { %987 = vset.pattern.permute.xlu0 %v1014_v4  ;;  %130 = vperm.xlu1 %985, %v29_v42  }
  0xea   :  { %126 = vperm.xlu0 %987, %v28_v32  }
  0xed   :  { %986 = vset.pattern.permute.xlu1 %v1015_v43 }
  0xee   :  { %99 = vperm.xlu1 %986, %v30_v47  }
  0xf2   :  { %988 = vset.pattern.permute.xlu1 %v1014_v4 }
  0xf3   :  { %134 = vperm.xlu1 %988, %v30_v47  }
  0xf6   :  { %v404_v54 = vpop.permute.xlu0 %403 }
  0xf7   :  { %v501_v55 = vmin.f32 %v404_v54, %v1363_v51 }
  0xf9   :  { %v697_v59 = vsub.f32 %v501_v55, %v665_v56 }
  0xfa   :  { %v409_v4 = vpop.permute.xlu1 %408 }
  0xfb   :  { %v329_v57 = vpop.permute.xlu0 %328  ;;  %v502_v61 = vmin.f32 %v409_v4, %v1363_v51  ;;  %v729_v5 = vmax.f32 %v697_v59, 0.0 }
  0xfc   :  { %v486_v60 = vmin.f32 %v329_v57, %v1363_v51 }
  0xfd   :  { %v698_v63 = vsub.f32 %v502_v61, %v666_v58  ;;  %v671_v58 = vmax.f32 %v1370_v53, %v1368_v52 }
  0xfe   :  { %v682_v1 = vsub.f32 %v486_v60, %v650_v62  ;;  %v324_v3 = vpop.permute.xlu1 %323 }
  0xff   :  { %v419_v2 = vpop.permute.xlu0 %418  ;;  %v730_v6 = vmax.f32 %v698_v63, 0.0  ;;  %v485_v8 = vmin.f32 %v324_v3, %v1363_v51 }
 0x100   :  { %v504_v7 = vmin.f32 %v419_v2, %v1363_v51  ;;  %v714_v13 = vmax.f32 %v682_v1, 0.0 }
 0x101   :  { %v681_v10 = vsub.f32 %v485_v8, %v649_v0  ;;  %v926_v11 = vpack.c.bf16 %v730_v6, %v729_v5 }
 0x102   :  { %v414_v15 = vpop.permute.xlu1 %413  ;;  %v700_v16 = vsub.f32 %v504_v7, %v668_v9 }
 0x103   :  { %v339_v14 = vpop.permute.xlu0 %338  ;;  %v713_v17 = vmax.f32 %v681_v10, 0.0  ;;  %v503_v19 = vmin.f32 %v414_v15, %v1363_v51  ;;  %927 = vmatprep.subr.bf16.mxu0 %v926_v11  ;;  %958 = vmatprep.subr.bf16.mxu1 %v926_v11 }
 0x104   :  { %v488_v18 = vmin.f32 %v339_v14, %v1363_v51  ;;  %v732_v24 = vmax.f32 %v700_v16, 0.0 }
 0x105   :  { %v699_v33 = vsub.f32 %v503_v19, %v667_v12  ;;  %v928_v34 = vpack.c.bf16 %v714_v13, %v713_v17 }
 0x106   :  { %v684_v21 = vsub.f32 %v488_v18, %v652_v20  ;;  %v334_v36 = vpop.permute.xlu1 %333 }
 0x107   :  { %v429_v35 = vpop.permute.xlu0 %428  ;;  %v731_v23 = vmax.f32 %v699_v33, 0.0  ;;  %v487_v38 = vmin.f32 %v334_v36, %v1363_v51  ;;  %929 = vmatpush3.bf16.msra.mxu0 %v928_v34  ;;  %966 = vmatpush3.bf16.msra.mxu1 %v928_v34 }
 0x108   :  { %v506_v37 = vmin.f32 %v429_v35, %v1363_v51  ;;  %v716_v28 = vmax.f32 %v684_v21, 0.0 }
 0x109   :  { %v683_v26 = vsub.f32 %v487_v38, %v651_v22  ;;  %v930_v25 = vpack.c.bf16 %v732_v24, %v731_v23 }
 0x10a   :  { %v424_v41 = vpop.permute.xlu1 %423  ;;  %v702_v42 = vsub.f32 %v506_v37, %v670_v39 }
 0x10b   :  { %v349_v27 = vpop.permute.xlu0 %348  ;;  %v715_v30 = vmax.f32 %v683_v26, 0.0  ;;  %v505_v43 = vmin.f32 %v424_v41, %v1363_v51  ;;  %931 = vmatprep.subr.bf16.mxu0 %v930_v25  ;;  %959 = vmatprep.subr.bf16.mxu1 %v930_v25 }
 0x10c   :  { %v490_v29 = vmin.f32 %v349_v27, %v1363_v51  ;;  %v734_v54 = vmax.f32 %v702_v42, 0.0 }
 0x10d   :  { %v701_v32 = vsub.f32 %v505_v43, %v669_v40  ;;  %v932_v31 = vpack.c.bf16 %v716_v28, %v715_v30 }
 0x10e   :  { %v686_v45 = vsub.f32 %v490_v29, %v654_v44  ;;  %v344_v48 = vpop.permute.xlu1 %343 }
 0x10f   :  { %v439_v47 = vpop.permute.xlu0 %438  ;;  %v733_v55 = vmax.f32 %v701_v32, 0.0  ;;  %v489_v56 = vmin.f32 %v344_v48, %v1363_v51  ;;  %933 = vmatpush3.bf16.msra.mxu0 %v932_v31  ;;  %967 = vmatpush3.bf16.msra.mxu1 %v932_v31 }
 0x110   :  { %v718_v50 = vmax.f32 %v686_v45, 0.0  ;;  %v508_v61 = vmin.f32 %v439_v47, %v1363_v51 }
 0x111   :  { %v685_v57 = vsub.f32 %v489_v56, %v653_v46  ;;  %v934_v4 = vpack.c.bf16 %v734_v54, %v733_v55 }
 0x112   :  { %v434_v60 = vpop.permute.xlu1 %433 }
 0x113   :  { %v611_v59 = vpop.permute.xlu0 %610  ;;  %v717_v62 = vmax.f32 %v685_v57, 0.0  ;;  %v507_v49 = vmin.f32 %v434_v60, %v1363_v51  ;;  %935 = vmatprep.subr.bf16.mxu0 %v934_v4  ;;  %960 = vmatprep.subr.bf16.mxu1 %v934_v4 }
 0x114   :  { %v672_v63 = vmax.f32 %v611_v59, %v1368_v52 }
 0x115   :  { %v703_v1 = vsub.f32 %v507_v49, %v671_v58  ;;  %v936_v2 = vpack.c.bf16 %v718_v50, %v717_v62 }
 0x116   :  { %v704_v0 = vsub.f32 %v508_v61, %v672_v63  ;;  %v354_v5 = vpop.permute.xlu1 %353 }
 0x117   :  { %v359_v3 = vpop.permute.xlu0 %358  ;;  %v735_v7 = vmax.f32 %v703_v1, 0.0  ;;  %937 = vmatpush3.bf16.msra.mxu0 %v936_v2  ;;  %968 = vmatpush3.bf16.msra.mxu1 %v936_v2  ;;  %v491_v11 = vmin.f32 %v354_v5, %v1363_v51 }
 0x118   :  { %v736_v6 = vmax.f32 %v704_v0, 0.0  ;;  %v492_v8 = vmin.f32 %v359_v3, %v1363_v51 }
 0x11a   :  { %v938_v53 = vpack.c.bf16 %v736_v6, %v735_v7  ;;  %v543_v10 = vpop.permute.xlu1 %542 }
 0x11b   :  { %v547_v9 = vpop.permute.xlu0 %546  ;;  %v655_v13 = vmax.f32 %v543_v10, %v1368_v52 }
 0x11c   :  { %v656_v12 = vmax.f32 %v547_v9, %v1368_v52  ;;  %939 = vmatprep.subr.bf16.mxu0 %v938_v53  ;;  %961 = vmatprep.subr.bf16.mxu1 %v938_v53 }
 0x11d   :  { %v687_v15 = vsub.f32 %v491_v11, %v655_v13 }
 0x11e   :  { %v688_v14 = vsub.f32 %v492_v8, %v656_v12  ;;  %v444_v17 = vpop.permute.xlu1 %443 }
 0x11f   :  { %v449_v16 = vpop.permute.xlu0 %448  ;;  %v719_v19 = vmax.f32 %v687_v15, 0.0  ;;  %v509_v21 = vmin.f32 %v444_v17, %v1363_v51 }
 0x120   :  { %v720_v18 = vmax.f32 %v688_v14, 0.0  ;;  %v510_v33 = vmin.f32 %v449_v16, %v1363_v51 }
 0x122   :  { %v940_v20 = vpack.c.bf16 %v720_v18, %v719_v19  ;;  %v615_v22 = vpop.permute.xlu1 %614 }
 0x123   :  { %v619_v34 = vpop.permute.xlu0 %618  ;;  %v673_v36 = vmax.f32 %v615_v22, %v1368_v52 }
 0x124   :  { %v674_v35 = vmax.f32 %v619_v34, %v1368_v52  ;;  %941 = vmatpush3.bf16.msra.mxu0 %v940_v20  ;;  %969 = vmatpush3.bf16.msra.mxu1 %v940_v20 }
 0x125   :  { %v705_v23 = vsub.f32 %v509_v21, %v673_v36 }
 0x126   :  { %v706_v24 = vsub.f32 %v510_v33, %v674_v35  ;;  %v364_v38 = vpop.permute.xlu1 %363 }
 0x127   :  { %v369_v37 = vpop.permute.xlu0 %368  ;;  %v737_v26 = vmax.f32 %v705_v23, 0.0  ;;  %v493_v41 = vmin.f32 %v364_v38, %v1363_v51 }
 0x128   :  { %v738_v39 = vmax.f32 %v706_v24, 0.0  ;;  %v494_v40 = vmin.f32 %v369_v37, %v1363_v51 }
 0x12a   :  { %v942_v25 = vpack.c.bf16 %v738_v39, %v737_v26  ;;  %v551_v27 = vpop.permute.xlu1 %550 }
 0x12b   :  { %v555_v28 = vpop.permute.xlu0 %554  ;;  %v657_v30 = vmax.f32 %v551_v27, %v1368_v52 }
 0x12c   :  { %v658_v42 = vmax.f32 %v555_v28, %v1368_v52  ;;  %943 = vmatprep.subr.bf16.mxu0 %v942_v25  ;;  %962 = vmatprep.subr.bf16.mxu1 %v942_v25 }
 0x12d   :  { %v689_v43 = vsub.f32 %v493_v41, %v657_v30 }
 0x12e   :  { %v690_v29 = vsub.f32 %v494_v40, %v658_v42  ;;  %v454_v32 = vpop.permute.xlu1 %453 }
 0x12f   :  { %v459_v44 = vpop.permute.xlu0 %458  ;;  %v721_v45 = vmax.f32 %v689_v43, 0.0  ;;  %v511_v55 = vmin.f32 %v454_v32, %v1363_v51  ;;  %v72_v32 = vlaneseq }
 0x130   :  { %v722_v31 = vmax.f32 %v690_v29, 0.0  ;;  %v512_v48 = vmin.f32 %v459_v44, %v1363_v51 }
 0x132   :  { %v944_v47 = vpack.c.bf16 %v722_v31, %v721_v45  ;;  %v623_v54 = vpop.permute.xlu1 %622 }
 0x133   :  { %v627_v46 = vpop.permute.xlu0 %626  ;;  %v675_v57 = vmax.f32 %v623_v54, %v1368_v52 }
 0x134   :  { %v676_v56 = vmax.f32 %v627_v46, %v1368_v52  ;;  %945 = vmatpush3.bf16.msra.mxu0 %v944_v47  ;;  %970 = vmatpush3.bf16.msra.mxu1 %v944_v47 }
 0x135   :  { %v707_v58 = vsub.f32 %v511_v55, %v675_v57  ;;  %v73_v55 = vshrl.u32 %v72_v32, 7  ;;  %v33_v57 = vld [vmem:[%s1473_s2] ss:$8 sm:$0x3] }
 0x136   :  { %v708_v4 = vsub.f32 %v512_v48, %v676_v56  ;;  %v374_v59 = vpop.permute.xlu1 %373 }
 0x137   :  { %v379_v50 = vpop.permute.xlu0 %378  ;;  %v739_v61 = vmax.f32 %v707_v58, 0.0  ;;  %v495_v1 = vmin.f32 %v374_v59, %v1363_v51 }
 0x138   :  { %v740_v60 = vmax.f32 %v708_v4, 0.0  ;;  %v496_v63 = vmin.f32 %v379_v50, %v1363_v51  ;;  %v878_v4 = vld [vmem:[%s1473_s2 + $0x1] ss:$8 sm:$0x3] }
 0x13a   :  { %v946_v62 = vpack.c.bf16 %v740_v60, %v739_v61  ;;  %v559_v0 = vpop.permute.xlu1 %558 }
 0x13b   :  { %v563_v49 = vpop.permute.xlu0 %562  ;;  %v659_v3 = vmax.f32 %v559_v0, %v1368_v52 }
 0x13c   :  { %v660_v2 = vmax.f32 %v563_v49, %v1368_v52  ;;  %947 = vmatprep.subr.bf16.mxu0 %v946_v62  ;;  %963 = vmatprep.subr.bf16.mxu1 %v946_v62  ;;  %v74_v49 = vsub.s32 0, %v73_v55 }
 0x13d   :  { %v691_v6 = vsub.f32 %v495_v1, %v659_v3 }
 0x13e   :  { %v692_v5 = vsub.f32 %v496_v63, %v660_v2  ;;  %v464_v53 = vpop.permute.xlu1 %463  ;;  %v70_v63 = vadd.f32 %v878_v4, %v33_v57  ;;  %v78_v2 = vsub.s32 1, %v73_v55 }
 0x13f   :  { %v469_v7 = vpop.permute.xlu0 %468  ;;  %v723_v9 = vmax.f32 %v691_v6, 0.0  ;;  %v513_v14 = vmin.f32 %v464_v53, %v1363_v51 }
 0x140   :  { %v724_v8 = vmax.f32 %v692_v5, 0.0  ;;  %v514_v11 = vmin.f32 %v469_v7, %v1363_v51  ;;  %v75_v53 = vrot.slane %v70_v63, %v74_v49 }
 0x142   :  { %v948_v10 = vpack.c.bf16 %v724_v8, %v723_v9  ;;  %v631_v13 = vpop.permute.xlu1 %630  ;;  %v79_v8 = vrot.slane %v70_v63, %v78_v2 }
 0x143   :  { %v635_v12 = vpop.permute.xlu0 %634  ;;  %v677_v16 = vmax.f32 %v631_v13, %v1368_v52 }
 0x144   :  { %v678_v15 = vmax.f32 %v635_v12, %v1368_v52  ;;  %949 = vmatpush3.bf16.msra.mxu0 %v948_v10  ;;  %971 = vmatpush3.bf16.msra.mxu1 %v948_v10  ;;  %v114_v10 = vrot.slane %v33_v57, %v74_v49 }
 0x145   :  { %v709_v18 = vsub.f32 %v513_v14, %v677_v16 }
 0x146   :  { %v710_v17 = vsub.f32 %v514_v11, %v678_v15  ;;  %v384_v20 = vpop.permute.xlu1 %383 }
 0x147   :  { %v389_v19 = vpop.permute.xlu0 %388  ;;  %v741_v34 = vmax.f32 %v709_v18, 0.0  ;;  %v497_v24 = vmin.f32 %v384_v20, %v1363_v51 }
 0x148   :  { %v742_v33 = vmax.f32 %v710_v17, 0.0  ;;  %v498_v21 = vmin.f32 %v389_v19, %v1363_v51 }
 0x14a   :  { %v950_v22 = vpack.c.bf16 %v742_v33, %v741_v34  ;;  %v567_v36 = vpop.permute.xlu1 %566 }
 0x14b   :  { %v571_v35 = vpop.permute.xlu0 %570  ;;  %v661_v37 = vmax.f32 %v567_v36, %v1368_v52 }
 0x14c   :  { %v662_v23 = vmax.f32 %v571_v35, %v1368_v52  ;;  %951 = vmatprep.subr.bf16.mxu0 %v950_v22  ;;  %964 = vmatprep.subr.bf16.mxu1 %v950_v22 }
 0x14d   :  { %v693_v39 = vsub.f32 %v497_v24, %v661_v37 }
 0x14e   :  { %v694_v38 = vsub.f32 %v498_v21, %v662_v23  ;;  %v474_v25 = vpop.permute.xlu1 %473 }
 0x14f   :  { %v479_v26 = vpop.permute.xlu0 %478  ;;  %v725_v28 = vmax.f32 %v693_v39, 0.0  ;;  %v515_v29 = vmin.f32 %v474_v25, %v1363_v51 }
 0x150   :  { %v726_v40 = vmax.f32 %v694_v38, 0.0  ;;  %v516_v41 = vmin.f32 %v479_v26, %v1363_v51 }
 0x152   :  { %v952_v27 = vpack.c.bf16 %v726_v40, %v725_v28  ;;  %v639_v30 = vpop.permute.xlu1 %638 }
 0x153   :  { %v643_v42 = vpop.permute.xlu0 %642  ;;  %v679_v44 = vmax.f32 %v639_v30, %v1368_v52 }
 0x154   :  { %v680_v43 = vmax.f32 %v643_v42, %v1368_v52  ;;  %953 = vmatpush3.bf16.msra.mxu0 %v952_v27  ;;  %972 = vmatpush3.bf16.msra.mxu1 %v952_v27 }
 0x155   :  { %v711_v45 = vsub.f32 %v515_v29, %v679_v44 }
 0x156   :  { %v712_v31 = vsub.f32 %v516_v41, %v680_v43  ;;  %v394_v48 = vpop.permute.xlu1 %393 }
 0x157   :  { %v399_v47 = vpop.permute.xlu0 %398  ;;  %v743_v54 = vmax.f32 %v711_v45, 0.0  ;;  %v499_v60 = vmin.f32 %v394_v48, %v1363_v51 }
 0x158   :  { %v744_v46 = vmax.f32 %v712_v31, 0.0  ;;  %v500_v58 = vmin.f32 %v399_v47, %v1363_v51  ;;  %v118_v51 = vrot.slane %v33_v57, %v78_v2 }
 0x15a   :  { %v954_v56 = vpack.c.bf16 %v744_v46, %v743_v54  ;;  %v575_v59 = vpop.permute.xlu1 %574 }
 0x15b   :  { %v579_v50 = vpop.permute.xlu0 %578  ;;  %v663_v62 = vmax.f32 %v575_v59, %v1368_v52 }
 0x15c   :  { %v664_v61 = vmax.f32 %v579_v50, %v1368_v52  ;;  %955 = vmatprep.subr.bf16.mxu0 %v954_v56  ;;  %965 = vmatprep.subr.bf16.mxu1 %v954_v56  ;;  %v879_v52 = vld [vmem:[%s1473_s2 + $0x2] ss:$8 sm:$0x3]  ;;  %s1017_s2 = smov [#allocation2]  }
 0x15d   :  { %v695_v1 = vsub.f32 %v499_v60, %v663_v62  ;;  %v749_v18 = vrot.slane %v879_v52, %v74_v49  ;;  %v753_v36 = vrot.slane %v879_v52, %v78_v2  ;;  %v1016_v62 = vmov 0.0   ;;  %s867_s18 = sshll.u32 %s1017_s2, 4  ;;  %s868_s18 = int_to_ptr.vmem [resolvable:$true] %s867_s18 }
 0x15e   :  { %v696_v0 = vsub.f32 %v500_v58, %v664_v61  ;;  %23 = vst.msk [vmem:[#allocation2] sm:$0xff] %vm22_vm0, %v1016_v62  ;;  %24 = vst.msk [vmem:[#allocation2 + $0x8] sm:$0xff] %vm22_vm0, %v1016_v62  ;;  %s989_s20 = scalar_lea.vmem %s868_s18, 512  ;;  %p994_p1 = scmp.lt.s32.totalorder %s868_s18, %s868_s18 }
 0x15f   :  { %v727_v5 = vmax.f32 %v695_v1, 0.0  ;;  %v85_v6 = vpop.permute.xlu1 %84  ;;  %25 = vst.msk [vmem:[#allocation2 + $0x10] sm:$0xff] %vm22_vm0, %v1016_v62  ;;  %26 = vst.msk [vmem:[#allocation2 + $0x18] sm:$0xff] %vm22_vm0, %v1016_v62  ;;  %p990_p0 = scmp.ne.s32.totalorder %s868_s18, %s989_s20  ;;  %p995_p2 = scmp.lt.s32.totalorder %s989_s20, %s989_s20 }
 0x160   :  { %v728_v3 = vmax.f32 %v696_v0, 0.0  ;;  %v95_v7 = vpop.permute.xlu0 %94  ;;  %v102_v13 = vmin.f32 %v75_v53, %v85_v6  ;;  %v103_v14 = vmin.f32 %v79_v8, %v85_v6 }
 0x161   :  { %v106_v17 = vmin.f32 %v75_v53, %v95_v7  ;;  %v107_v22 = vmin.f32 %v79_v8, %v95_v7  ;;  %p996_p3 = por %p995_p2, %p994_p1 }
 0x162   :  { %v956_v9 = vpack.c.bf16 %v728_v3, %v727_v5 }
 0x163   :  { %p997_p4 = pnand %p996_p3, %p990_p0 }
 0x164   :  { %957 = vmatpush3.bf16.msra.mxu0 %v956_v9  ;;  %973 = vmatpush3.bf16.msra.mxu1 %v956_v9  ;;  %v90_v11 = vpop.permute.xlu0 %89  ;;  %v123_v12 = vpop.permute.xlu1 %122 }
 0x165   :  { %v137_v15 = vmax.f32 %v114_v10, %v123_v12  ;;  %v138_v16 = vmax.f32 %v118_v51, %v123_v12  ;;  %v104_v19 = vmin.f32 %v75_v53, %v90_v11  ;;  %v105_v20 = vmin.f32 %v79_v8, %v90_v11  ;;  %v764_v49 = vld [vmem:[#allocation2] sm:$0xff]  ;;  %v765_v6 = vld [vmem:[#allocation2 + $0x8] sm:$0xff] }
 0x166   :  { %v767_v12 = vld [vmem:[#allocation2 + $0x18] sm:$0xff] }
 0x167   :  { %v145_v33 = vsub.f32 %v102_v13, %v137_v15  ;;  %v146_v34 = vsub.f32 %v103_v14, %v138_v16 }
 0x168   :  { %v131_v35 = vpop.permute.xlu1 %130 }
 0x169   :  { %v127_v21 = vpop.permute.xlu0 %126  ;;  %v153_v24 = vmax.f32 %v145_v33, 0.0  ;;  %v141_v38 = vmax.f32 %v114_v10, %v131_v35  ;;  %v142_v39 = vmax.f32 %v118_v51, %v131_v35  ;;  %v154_v26 = vmax.f32 %v146_v34, 0.0 }
 0x16a   :  { %v139_v23 = vmax.f32 %v114_v10, %v127_v21  ;;  %v140_v37 = vmax.f32 %v118_v51, %v127_v21 }
 0x16b   :  { %v149_v28 = vsub.f32 %v106_v17, %v141_v38  ;;  %v756_v27 = vmul.f32 %v749_v18, %v153_v24  ;;  %v757_v41 = vmul.f32 %v753_v36, %v154_v26  ;;  %v150_v42 = vsub.f32 %v107_v22, %v142_v39 }
 0x16c   :  { %v147_v25 = vsub.f32 %v104_v19, %v139_v23  ;;  %v148_v40 = vsub.f32 %v105_v20, %v140_v37 }
 0x16d   :  { %v157_v43 = vmax.f32 %v149_v28, 0.0  ;;  %v100_v44 = vpop.permute.xlu1 %99  ;;  %832 = vmatprep.mubr.f32.mxu0 %v757_v41  ;;  %v158_v32 = vmax.f32 %v150_v42, 0.0 }
 0x16e   :  { %v155_v30 = vmax.f32 %v147_v25, 0.0  ;;  %v156_v29 = vmax.f32 %v148_v40, 0.0  ;;  %833 = vmatmul.mubr.f32.vlgmr.msra.gmra.mrb[0].mxu0 %v756_v27  ;;  %v108_v46 = vmin.f32 %v75_v53, %v100_v44  ;;  %v109_v55 = vmin.f32 %v79_v8, %v100_v44  ;;  %v766_v53 = vld [vmem:[#allocation2 + $0x10] sm:$0xff] }
 0x16f   :  { %v760_v47 = vmul.f32 %v749_v18, %v157_v43  ;;  %v761_v48 = vmul.f32 %v753_v36, %v158_v32 }
 0x170   :  { %v759_v31 = vmul.f32 %v753_v36, %v156_v29  ;;  %v758_v45 = vmul.f32 %v749_v18, %v155_v30 }
 0x171   :  { %842 = vmatprep.mubr.f32.mxu1 %v761_v48 }
 0x172   :  { %837 = vmatprep.mubr.f32.mxu0 %v759_v31  ;;  %v135_v54 = vpop.permute.xlu1 %134  ;;  %843 = vmatmul.mubr.f32.vlgmr.msra.gmra.mrb[0].mxu1 %v760_v47 }
 0x173   :  { %838 = vmatmul.mubr.f32.gmra.mrb[2].mxu0 %v758_v45  ;;  %v143_v56 = vmax.f32 %v114_v10, %v135_v54  ;;  %v144_v57 = vmax.f32 %v118_v51, %v135_v54 }
 0x175   :  { %v151_v4 = vsub.f32 %v108_v46, %v143_v56  ;;  %v152_v58 = vsub.f32 %v109_v55, %v144_v57 }
 0x177   :  { %v159_v50 = vmax.f32 %v151_v4, 0.0  ;;  %v160_v59 = vmax.f32 %v152_v58, 0.0 }
 0x179   :  { %v763_v60 = vmul.f32 %v753_v36, %v160_v59  ;;  %v762_v61 = vmul.f32 %v749_v18, %v159_v50 }
 0x17b   :  { %847 = vmatprep.mubr.f32.mxu1 %v763_v60 }
 0x17c   :  { %848 = vmatmul.mubr.f32.gmra.mrb[2].mxu1 %v762_v61 }
 0x241   :  { %v914_v63 = vpop.f32.mrb[0].mxu0 }
 0x242   :  { %v915_v0 = vpop.f32.mrb[1].mxu0 }
 0x243   :  { %v916_v1 = vadd.f32 %v915_v0, %v914_v63 }
 0x245   :  { %v853_v2 = vadd.f32 %v916_v1, %v764_v49  ;;  %v920_v5 = vpop.f32.mrb[0].mxu1 }
 0x246   :  { %v917_v3 = vpop.f32.mrb[2].mxu0  ;;  %v921_v8 = vpop.f32.mrb[1].mxu1 }
 0x247   :  { %v918_v7 = vpop.f32.mrb[3].mxu0  ;;  %858 = vst.msk [vmem:[#allocation2] sm:$0xff] %vm22_vm0, %v853_v2  ;;  %v922_v10 = vadd.f32 %v921_v8, %v920_v5 }
 0x248   :  { %v919_v9 = vadd.f32 %v918_v7, %v917_v3 }
 0x249   :  { %v855_v11 = vadd.f32 %v922_v10, %v766_v53 }
 0x24a   :  { %v854_v51 = vadd.f32 %v919_v9, %v765_v6 }
 0x24b   :  { %860 = vst.msk [vmem:[#allocation2 + $0x10] sm:$0xff] %vm22_vm0, %v855_v11 }
 0x24c   :  { %859 = vst.msk [vmem:[#allocation2 + $0x8] sm:$0xff] %vm22_vm0, %v854_v51 }
 0x24f   :  { %v923_v52 = vpop.f32.mrb[2].mxu1 }
 0x250   :  { %v924_v13 = vpop.f32.mrb[3].mxu1 }
 0x251   :  { %v925_v14 = vadd.f32 %v924_v13, %v923_v52 }
 0x253   :  { %v856_v15 = vadd.f32 %v925_v14, %v767_v12 }
 0x255   :  { %861 = vst.msk [vmem:[#allocation2 + $0x18] sm:$0xff] %vm22_vm0, %v856_v15 }
 0x256   :  { %1000 = shalt.err (!%p997_p4)
}
 0x257   :  { %s1001_s23 = scalar_lea.hbm %s1475_s4, 512 }
 0x258   :  { %p1002_p5 = scmp.ne.s32.totalorder %s1475_s4, %s1001_s23  ;;  %p1005_p6 = scmp.lt.u32.totalorder %s1001_s23, %s1475_s4 }
 0x25a   :  { %p1007_p7 = pnand %p1005_p6, %p1002_p5 }
 0x25c   :  { %1010 = shalt.err (!%p1007_p7)
}
 0x25d   :  { %s1018_s28 = smov 128   ;;  %s1019_s29 = smov 8  }
 0x25e   :  { %873 = dma.vmem_to_hbm [thread:$0]  %s868_s18, 512, %s1475_s4, [#allocation3], %s1018_s28, %s1018_s28, %s1019_s29  }
 0x25f   :  { %1011 = dma.done.wait [#allocation3], 512  }
 0x260   :  { %1012 = vsyncadd [#allocation3], 4294966784 }
 0x261   :  { %877 = vsyncpa [#allocation3], 1 }

</bundles_post_ra>
